<compile_context>
chip_gen: v5e
topology: v5e:2x2
jax: 0.10.0
libtpu: 0.0.40
codegen_flags: <defaults>
</compile_context>

<pallas_src>
import jax
import jax.numpy as jnp
from jax.experimental import pallas as pl
from jax.experimental.pallas import tpu as pltpu

ALPHA = 0.25
GAMMA = 2.0   # NOTE: kernel assumes gamma == 2 (explicit squaring).


def focal_loss_kernel(logits_ref, targets_ref, out_ref):
    # logits_ref:  (TILE_N, C) float   -- one batch tile, full class row
    # targets_ref: (TILE_N, 1) int32   -- class index per row (-1 = padded row)
    # out_ref:     (1, 8, 128) f32     -- per-partial accumulator block
    #                                     (scalar sum replicated over 1024 elems)
    i = pl.program_id(1)  # reduction ("arbitrary") axis over batch tiles

    @pl.when(i == 0)
    def _init():
        out_ref[...] = jnp.zeros_like(out_ref)

    x = logits_ref[...].astype(jnp.float32)              # (TILE_N, C)
    t = targets_ref[...]                                  # (TILE_N, 1) int32
    tn, c = x.shape

    # Numerically stable softmax pieces along the class (lane) axis.
    m = jnp.max(x, axis=-1, keepdims=True)                # (TILE_N, 1)
    z = x - m
    ez = jnp.exp(z)                                        # block exp (EUP)
    sumexp = jnp.sum(ez, axis=-1, keepdims=True)           # (TILE_N, 1)
    lse = jnp.log(sumexp)                                  # (TILE_N, 1)

    # One-hot select of the target logit / target prob (no gather needed).
    # Padded / garbage rows carry t == -1 -> no match -> masked out below.
    # Targets >= C (invalid labels) never match either: they yield a finite
    # loss of alpha * lse instead of an error (documented behaviour).
    cls_idx = jax.lax.broadcasted_iota(jnp.int32, (tn, c), 1)   # (TILE_N, C)
    onehot = cls_idx == t
    z_t = jnp.sum(jnp.where(onehot, z, 0.0), axis=-1, keepdims=True)
    p_t = jnp.sum(jnp.where(onehot, ez, 0.0), axis=-1, keepdims=True)

    # Cross entropy and pt.  pt reuses exp(z) instead of a second per-row
    # exp(-ce) (EUP saving on v7x/v6e).  approx=True is a further EUP saving
    # when bf16-level accuracy is acceptable; kept exact here.
    ce = lse - z_t                                          # (TILE_N, 1)
    pt = p_t * pl.reciprocal(sumexp, approx=False)          # (TILE_N, 1)

    # Focal weighting: alpha * (1 - pt)^2 * ce (explicit square, clamped).
    one_minus_pt = jnp.maximum(1.0 - pt, 0.0)
    focal = ALPHA * (one_minus_pt * one_minus_pt) * ce      # (TILE_N, 1)

    # Rows with t < 0 (host padding / edge / duplicated blocks) contribute 0.
    # Any NaN/Inf computed from garbage logits on those rows lives only in the
    # non-selected branch of this where, so the sum stays finite.
    focal = jnp.where(t >= 0, focal, 0.0)

    # Accumulate the tile's focal-loss sum into the resident output block
    # (single broadcast add per tile; written back to HBM once per partial).
    out_ref[...] += jnp.sum(focal)


def focal_loss(logits, targets, *, num_partials=1, max_tile_n=4096,
               vmem_budget_bytes=20 * 1024 * 1024):
    """Mean focal loss (alpha=0.25, gamma=2) over (N, C) logits + int targets.

    Callers may pass bf16 logits (streamed as-is from HBM, upcast to f32
    inside the kernel) to halve HBM bytes.  num_partials=1 is right for the
    single-TensorCore v5e/v6e; use num_partials=2 on v7x so each core streams
    half of the rows.
    """
    n, c = logits.shape
    itemsize = int(jnp.dtype(logits.dtype).itemsize)

    # --- Tile sizing --------------------------------------------------------
    # VMEM per row: 2x double-buffered logits rows + 2x the lane-padded
    # (tile_n, 1) int32 targets rows (512 B each) + ~4 block-sized f32
    # temporaries inside the kernel (upcast x, z, exp(z), where-selects).
    # The 20 MiB default budget keeps this under v7x's 32 MiB scoped VMEM
    # (tile_n caps near 4096 for f32, C=128); raise it on v5e/v6e (128 MiB).
    per_row_bytes = 2 * (c * itemsize + 512) + 4 * c * 4
    tile_cap = max(128, (vmem_budget_bytes // per_row_bytes) // 128 * 128)
    n_ceil8 = int(pl.cdiv(n, 8) * 8)
    tile_n = int(min(max_tile_n, tile_cap, n_ceil8))

    tiles_total = int(pl.cdiv(n, tile_n))
    num_partials = int(max(1, min(num_partials, tiles_total)))
    tiles_per_partial = int(pl.cdiv(tiles_total, num_partials))
    grid_rows = num_partials * tiles_per_partial            # >= tiles_total

    # Only the tiny targets array is padded (4 B per row): rows >= n carry
    # target = -1 and therefore contribute exactly zero loss.  The logits are
    # NOT copied/padded on the host -- garbage rows in edge blocks (and in the
    # clamped duplicate blocks below) are only ever read behind that mask.
    targets_p = jnp.full((grid_rows * tile_n, 1), -1, dtype=jnp.int32)
    targets_p = targets_p.at[:n, 0].set(targets.astype(jnp.int32))

    last_block = tiles_total - 1

    def logits_block(p, i):
        # Clamp so no logits block starts fully out of bounds; a clamped
        # (duplicate) block is neutralised because its targets rows are -1.
        return (jnp.minimum(p * tiles_per_partial + i, last_block), 0)

    def targets_block(p, i):
        return (p * tiles_per_partial + i, 0)

    partials = pl.pallas_call(
        focal_loss_kernel,
        out_shape=jax.ShapeDtypeStruct((num_partials, 8, 128), jnp.float32),
        grid_spec=pltpu.PrefetchScalarGridSpec(
            num_scalar_prefetch=0,
            grid=(num_partials, tiles_per_partial),
            in_specs=[
                pl.BlockSpec((tile_n, c), logits_block),
                pl.BlockSpec((tile_n, 1), targets_block),
            ],
            out_specs=pl.BlockSpec((1, 8, 128), lambda p, i: (p, 0, 0)),
        ),
        compiler_params=pltpu.CompilerParams(
            dimension_semantics=("parallel", "arbitrary"),
            vmem_limit_bytes=32 * 1024 * 1024,
        ),
        cost_estimate=pl.CostEstimate(
            flops=int(8 * grid_rows * tile_n * c),
            transcendentals=int(grid_rows * tile_n * (c + 2)),
            bytes_accessed=int(n * c * itemsize + grid_rows * tile_n * 4
                               + num_partials * 8 * 128 * 4),
        ),
    )(logits, targets_p)

    # Each (1, 8, 128) partial block holds its scalar sum replicated across
    # all 1024 elements -- read one element per partial, do NOT sum the block.
    return jnp.sum(partials[:, 0, 0]) / jnp.float32(n)


def focal_loss_ref(logits, targets):
    # Pure-JAX reference (mirrors torch semantics) for sanity checking.
    logp = jax.nn.log_softmax(logits.astype(jnp.float32), axis=-1)
    ce = -jnp.take_along_axis(logp, targets[:, None].astype(jnp.int32),
                              axis=-1)[:, 0]
    pt = jnp.exp(-ce)
    return jnp.mean(ALPHA * (1.0 - pt) ** GAMMA * ce)


if __name__ == "__main__":
    key = jax.random.PRNGKey(0)
    k1, k2 = jax.random.split(key)
    N, C = 8, 32  # batch of 8 samples, 32 classes
    logits = jax.random.normal(k1, (N, C), dtype=jnp.float32)
    targets = jax.random.randint(k2, (N,), 0, C, dtype=jnp.int32)

    out = focal_loss(logits, targets)
    jax.block_until_ready(out)

    ref = focal_loss_ref(logits, targets)
    assert jnp.allclose(out, ref, rtol=1e-5, atol=1e-6), (out, ref)
    print("KERNEL_OK")
</pallas_src>

<mosaic_0001>
module attributes {stable_mosaic.version = 11 : i64} {
  func.func @focal_loss_kernel(%arg0: i32, %arg1: i32, %arg2: memref<8x32xf32, #tpu.memory_space<vmem>>, %arg3: memref<8x1xi32, #tpu.memory_space<vmem>>, %arg4: memref<1x8x128xf32, #tpu.memory_space<vmem>>) attributes {dimension_semantics = [#tpu.dimension_semantics<parallel>, #tpu.dimension_semantics<arbitrary>], iteration_bounds = array<i64: 1, 1>, scalar_prefetch = 0 : i64, scratch_operands = 0 : i64, tpu.core_type = #tpu.core_type<tc>, window_params = [{transform_indices = @transform_0, window_bounds = array<i64: 8, 32>}, {transform_indices = @transform_1, window_bounds = array<i64: 8, 1>}, {transform_indices = @transform_2, window_bounds = array<i64: 1, 8, 128>}]} {
    %c0_i32 = arith.constant 0 : i32
    %0 = arith.cmpi eq, %arg1, %c0_i32 : i32
    %1 = arith.extui %0 : i1 to i32
    %c0_i32_0 = arith.constant 0 : i32
    %2 = arith.cmpi ne, %1, %c0_i32_0 : i32
    scf.if %2 {
      %cst_21 = arith.constant 0.000000e+00 : f32
      %47 = vector.broadcast %cst_21 : f32 to vector<1x8x128xf32>
      %c0_22 = arith.constant 0 : index
      %c0_23 = arith.constant 0 : index
      %c0_24 = arith.constant 0 : index
      %48 = vector.load %arg4[%c0_22, %c0_23, %c0_24] : memref<1x8x128xf32, #tpu.memory_space<vmem>>, vector<1x8x128xf32>
      tpu.vector_store %arg4[%c0_22, %c0_23, %c0_24], %47 {strides = array<i32>} : memref<1x8x128xf32, #tpu.memory_space<vmem>>, vector<1x8x128xf32>,
    } else {
    }
    %c0 = arith.constant 0 : index
    %c0_1 = arith.constant 0 : index
    %3 = vector.load %arg2[%c0, %c0_1] : memref<8x32xf32, #tpu.memory_space<vmem>>, vector<8x32xf32>
    %c0_2 = arith.constant 0 : index
    %c0_3 = arith.constant 0 : index
    %4 = vector.load %arg3[%c0_2, %c0_3] : memref<8x1xi32, #tpu.memory_space<vmem>>, vector<8x1xi32>
    %cst = arith.constant dense<0xFF800000> : vector<8xf32>
    %5 = vector.multi_reduction <maximumf>, %3, %cst [1] : vector<8x32xf32> to vector<8xf32>
    %6 = vector.shape_cast %5 : vector<8xf32> to vector<8x1xf32>
    %7 = vector.broadcast %6 : vector<8x1xf32> to vector<8x32xf32>
    %8 = arith.subf %3, %7 : vector<8x32xf32>
    %9 = math.exp %8 : vector<8x32xf32>
    %cst_4 = arith.constant dense<0.000000e+00> : vector<8xf32>
    %10 = vector.multi_reduction <add>, %9, %cst_4 [1] : vector<8x32xf32> to vector<8xf32>
    %11 = vector.shape_cast %10 : vector<8xf32> to vector<8x1xf32>
    %12 = math.log %11 : vector<8x1xf32>
    %13 = tpu.iota {dimensions = array<i32: 1>} : vector<8x32xi32>
    %14 = vector.broadcast %4 : vector<8x1xi32> to vector<8x32xi32>
    %15 = arith.cmpi eq, %13, %14 : vector<8x32xi32>
    %cst_5 = arith.constant 0.000000e+00 : f32
    %16 = vector.broadcast %cst_5 : f32 to vector<8x32xf32>
    %17 = arith.select %15, %8, %16 : vector<8x32xi1>, vector<8x32xf32>
    %cst_6 = arith.constant dense<0.000000e+00> : vector<8xf32>
    %18 = vector.multi_reduction <add>, %17, %cst_6 [1] : vector<8x32xf32> to vector<8xf32>
    %19 = vector.shape_cast %18 : vector<8xf32> to vector<8x1xf32>
    %cst_7 = arith.constant 0.000000e+00 : f32
    %20 = vector.broadcast %cst_7 : f32 to vector<8x32xf32>
    %21 = arith.select %15, %9, %20 : vector<8x32xi1>, vector<8x32xf32>
    %cst_8 = arith.constant dense<0.000000e+00> : vector<8xf32>
    %22 = vector.multi_reduction <add>, %21, %cst_8 [1] : vector<8x32xf32> to vector<8xf32>
    %23 = vector.shape_cast %22 : vector<8xf32> to vector<8x1xf32>
    %24 = arith.subf %12, %19 : vector<8x1xf32>
    %25 = tpu.reciprocal %11 : vector<8x1xf32> -> vector<8x1xf32>
    %26 = arith.mulf %23, %25 : vector<8x1xf32>
    %cst_9 = arith.constant 1.000000e+00 : f32
    %27 = vector.broadcast %cst_9 : f32 to vector<8x1xf32>
    %28 = arith.subf %27, %26 : vector<8x1xf32>
    %cst_10 = arith.constant 0.000000e+00 : f32
    %29 = vector.broadcast %cst_10 : f32 to vector<8x1xf32>
    %30 = arith.maximumf %28, %29 : vector<8x1xf32>
    %31 = arith.mulf %30, %30 : vector<8x1xf32>
    %cst_11 = arith.constant 2.500000e-01 : f32
    %32 = vector.broadcast %cst_11 : f32 to vector<8x1xf32>
    %33 = arith.mulf %32, %31 : vector<8x1xf32>
    %34 = arith.mulf %33, %24 : vector<8x1xf32>
    %c0_i32_12 = arith.constant 0 : i32
    %35 = vector.broadcast %c0_i32_12 : i32 to vector<8x1xi32>
    %36 = arith.cmpi sge, %4, %35 : vector<8x1xi32>
    %cst_13 = arith.constant 0.000000e+00 : f32
    %37 = vector.broadcast %cst_13 : f32 to vector<8x1xf32>
    %38 = arith.select %36, %34, %37 : vector<8x1xi1>, vector<8x1xf32>
    %c0_14 = arith.constant 0 : index
    %c0_15 = arith.constant 0 : index
    %c0_16 = arith.constant 0 : index
    %39 = vector.load %arg4[%c0_14, %c0_15, %c0_16] : memref<1x8x128xf32, #tpu.memory_space<vmem>>, vector<1x8x128xf32>
    %40 = vector.shape_cast %38 : vector<8x1xf32> to vector<1x8x1xf32>
    %cst_17 = arith.constant dense<0.000000e+00> : vector<1xf32>
    %41 = vector.multi_reduction <add>, %40, %cst_17 [1, 2] : vector<1x8x1xf32> to vector<1xf32>
    %42 = vector.shape_cast %41 : vector<1xf32> to vector<1x1x1xf32>
    %43 = vector.extract %42[0, 0, 0] : f32 from vector<1x1x1xf32>
    %44 = vector.broadcast %43 : f32 to vector<1x8x128xf32>
    %45 = arith.addf %39, %44 : vector<1x8x128xf32>
    %c0_18 = arith.constant 0 : index
    %c0_19 = arith.constant 0 : index
    %c0_20 = arith.constant 0 : index
    %46 = vector.load %arg4[%c0_18, %c0_19, %c0_20] : memref<1x8x128xf32, #tpu.memory_space<vmem>>, vector<1x8x128xf32>
    tpu.vector_store %arg4[%c0_18, %c0_19, %c0_20], %45 {strides = array<i32>} : memref<1x8x128xf32, #tpu.memory_space<vmem>>, vector<1x8x128xf32>,
    return
  }
  func.func @transform_0(%arg0: i32, %arg1: i32) -> (i32, i32) {
    %c1_i32 = arith.constant 1 : i32
    %0 = arith.muli %arg0, %c1_i32 : i32
    %1 = arith.addi %0, %arg1 : i32
    %c0_i32 = arith.constant 0 : i32
    %2 = arith.minsi %1, %c0_i32 : i32
    %c0_i32_0 = arith.constant 0 : i32
    %c0_i32_1 = arith.constant 0 : i32
    return %2, %c0_i32_0 : i32, i32
  }
  func.func @transform_1(%arg0: i32, %arg1: i32) -> (i32, i32) {
    %c1_i32 = arith.constant 1 : i32
    %0 = arith.muli %arg0, %c1_i32 : i32
    %1 = arith.addi %0, %arg1 : i32
    %c0_i32 = arith.constant 0 : i32
    %c0_i32_0 = arith.constant 0 : i32
    return %1, %c0_i32 : i32, i32
  }
  func.func @transform_2(%arg0: i32, %arg1: i32) -> (i32, i32, i32) {
    %c0_i32 = arith.constant 0 : i32
    %c0_i32_0 = arith.constant 0 : i32
    %c0_i32_1 = arith.constant 0 : i32
    return %arg0, %c0_i32, %c0_i32_0 : i32, i32, i32
  }
}

</mosaic_0001>

<bundles_post_ra>
// kernel: tpu_custom_call.1
= control target key start
LH: loop header
LB: loop body
LE: loop exit
PB: predicated region body
PF: predicated region fallthrough
CT: control target
= control target key end

     0   :  { %vm63_vm0 = vcmask 261120   ;;  %s223_s0 = inlined_call_operand.vmem [shape: f32[8,32], index: 0, kind: input, shape index: {}]   ;;  %s224_s1 = inlined_call_operand.vmem [shape: s32[8,1], index: 1, kind: input, shape index: {}]   ;;  %s225_s2 = inlined_call_operand.hbm [shape: f32[1,8,128], index: 2, kind: output, shape index: {}]  }
   0x1   :  { %v61_v0 = vld [vmem:[%s223_s0] sm:$0xff] }
   0x2   :  { %7 = vsyncpa [#allocation3], 0  ;;  %v64_v1 = vsel %vm63_vm0, %v61_v0, -inf  ;;  %v193_v2 = vmov 0   ;;  %v62_v3 = vld [vmem:[%s224_s1] sm:$0xff]  ;;  %v75_v9 = vlaneseq  ;;  %vm113_vm7 = vcmask 7168  }
   0x3   :  { %160 = vset.pattern.permute.xlu0 %v193_v2  ;;  %vm110_vm6 = vcmp.ge.s32.totalorder %v62_v3, 0  ;;  %s194_s0 = smov [#allocation2]   ;;  %s134_s15 = sshll.u32 %s225_s2, 4  ;;  %s135_s15 = int_to_ptr.hbm [resolvable:$true] %s134_s15 }
   0x4   :  { %65 = vmax.xlane.f32.xlu0 %v64_v1  ;;  %v76_v10 = vand.u32 127, %v75_v9  ;;  %s132_s1 = sshll.u32 %s194_s0, 4  ;;  %s133_s1 = int_to_ptr.vmem [resolvable:$true] %s132_s1 }
  0x18   :  { %78 = vperm.xlu0 %160, %v62_v3  }
  0x77   :  { %v66_v4 = vpop.xlane.xlu0 %65 }
  0x78   :  { %v67_v5 = vsub.f32 %v61_v0, %v66_v4 }
  0x7a   :  { %v68_v6 = vmul.f32 1.442695, %v67_v5 }
  0x7c   :  { %161 = vpow2.f32 %v68_v6 }
  0x82   :  { %v162_v7 = vpop.eup %161 }
  0x83   :  { %v70_v8 = vsel %vm63_vm0, %v162_v7, 0.0 }
  0x84   :  { %71 = vadd.xlane.f32.xlu1 %v70_v8 }
  0x8a   :  { %v79_v11 = vpop.permute.xlu0 %78 }
  0x8b   :  { %vm80_vm1 = vcmp.eq.s32.totalorder %v76_v10, %v79_v11 }
  0x8c   :  { %v85_v12 = vsel %vm80_vm1, %v162_v7, 0.0  ;;  %v81_v13 = vsel %vm80_vm1, %v67_v5, 0.0 }
  0x8d   :  { %v86_v14 = vsel %vm63_vm0, %v85_v12, 0.0  ;;  %v82_v15 = vsel %vm63_vm0, %v81_v13, 0.0 }
  0x8e   :  { %87 = vadd.xlane.f32.xlu1 %v86_v14  ;;  %83 = vadd.xlane.f32.xlu2 %v82_v15 }
  0xf7   :  { %v72_v16 = vpop.xlane.xlu1 %71 }
  0xf8   :  { %163 = vrcp.f32 %v72_v16  ;;  %v101_v20 = vand.u32 2147483648, %v72_v16  ;;  %v99_v22 = vand.u32 2147483647, %v72_v16  ;;  %vm95_vm3 = vweird.f32 %v72_v16 }
  0xf9   :  { %165 = vlog2.f32 %v72_v16 }
  0xfa   :  { %v102_v24 = vor.u32 1.1754944e-38, %v101_v20  ;;  %vm100_vm5 = vcmp.eq.f32.partialorder %v99_v22, 8.507059e+37 }
  0xfe   :  { %v164_v17 = vpop.eup %163 }
  0xff   :  { %v91_v18 = vmul.f32 %v164_v17, %v72_v16  ;;  %vm96_vm2 = vweird.f32 %v164_v17  ;;  %v166_v29 = vpop.eup %165 }
 0x100   :  { %vm97_vm4 = vmor %vm95_vm3, %vm96_vm2  ;;  %v74_v32 = vmul.f32 0.6931472, %v166_v29 }
 0x101   :  { %v92_v19 = vsub.f32 1.0, %v91_v18  ;;  %v88_v27 = vpop.xlane.xlu1 %87  ;;  %v84_v33 = vpop.xlane.xlu2 %83 }
 0x102   :  { %v89_v36 = vsub.f32 %v74_v32, %v84_v33 }
 0x103   :  { %v93_v21 = vmul.f32 %v164_v17, %v92_v19 }
 0x105   :  { %v94_v23 = vadd.f32 %v164_v17, %v93_v21 }
 0x107   :  { %v98_v25 = vsel %vm97_vm4, %v164_v17, %v94_v23 }
 0x108   :  { %v103_v26 = vsel %vm100_vm5, %v102_v24, %v98_v25 }
 0x109   :  { %v104_v28 = vmul.f32 %v103_v26, %v88_v27 }
 0x10b   :  { %v105_v30 = vsub.f32 1.0, %v104_v28 }
 0x10d   :  { %v106_v31 = vmax.f32 %v105_v30, 0.0 }
 0x10f   :  { %v107_v34 = vmul.f32 %v106_v31, %v106_v31 }
 0x111   :  { %v108_v35 = vmul.f32 0.25, %v107_v34 }
 0x113   :  { %v109_v37 = vmul.f32 %v108_v35, %v89_v36 }
 0x115   :  { %v111_v38 = vsel %vm110_vm6, %v109_v37, 0.0 }
 0x116   :  { %v114_v39 = vsel %vm113_vm7, %v111_v38, 0.0 }
 0x117   :  { %115 = vadd.xlane.f32.xlu2 %v114_v39 }
 0x18a   :  { %v116_v40 = vpop.xlane.xlu2 %115 }
 0x18b   :  { %v117_v41 = vrot.slane %v116_v40, 4 }
 0x18d   :  { %v118_v42 = vadd.f32 %v117_v41, %v116_v40 }
 0x18f   :  { %v119_v43 = vrot.slane %v118_v42, 2 }
 0x191   :  { %v120_v44 = vadd.f32 %v119_v43, %v118_v42 }
 0x193   :  { %v121_v45 = vrot.slane %v120_v44, 1 }
 0x195   :  { %v122_v46 = vadd.f32 %v121_v45, %v120_v44 }
 0x197   :  { %155 = vpush %v122_v46 }
 0x1c8   :  { %s156_s16 = spop %155 }
 0x1c9   :  { %v124_v47 = vstv %s156_s16 }
 0x1ca   :  { %126 = vst [vmem:[#allocation2] sm:$0xff] %v124_v47 }
 0x1cb   :  { %137 = dma.vmem_to_hbm [thread:$0]  %s133_s1, 128, %s135_s15, [#allocation3]  }
 0x1cc   :  { %191 = dma.done.wait [#allocation3], 128  }
 0x1cd   :  { %192 = vsyncadd [#allocation3], 4294967168 }
 0x1ce   :  { %142 = vsyncpa [#allocation3], 1 }

</bundles_post_ra>
